<compile_context>
chip_gen: v6e
topology: v6e:2x2x1
jax: 0.10.0
libtpu: 0.0.40
codegen_flags: <defaults>
</compile_context>

<pallas_src>
import jax
import jax.numpy as jnp
from jax.experimental import pallas as pl
from jax.experimental.pallas import tpu as pltpu

NCLS_PAD = 128  # lane-dense padded class dimension used *inside* the kernel


def label_predictor_kernel(x_ref, w1_ref, b1_ref, w2_ref, b2_ref, o_ref):
    # In-kernel bf16 cast of the f32 activation tile (saves a wrapper-side cast pass
    # over x; the VPU cast rides under the DMA shadow of this HBM-bound kernel).
    x_bf = x_ref[...].astype(jnp.bfloat16)
    # fc1: bf16 MXU operands, f32 accumulation; bias + ReLU stay in f32.
    h = jnp.dot(x_bf, w1_ref[...], preferred_element_type=jnp.float32)
    h = jnp.maximum(h + b1_ref[...], 0.0)
    # TODO(synk): dropout is implemented as eval-mode identity (training=False).
    # fc2 over a 128-lane padded class dim (zero-padded W2 columns, -1e30-padded
    # bias -> padded logits never win the max and vanish under exp).
    # NOTE: N=128 deliberately half-fills the 256-wide MXU on v6e/v7x (full width on
    # v5e's 128x128 MXU). Do NOT "optimize" by padding classes to 256: the kernel is
    # HBM/step-overhead bound, not MXU bound, and that would only add VMEM/HBM bytes.
    logits = jnp.dot(h.astype(w2_ref.dtype), w2_ref[...],
                     preferred_element_type=jnp.float32) + b2_ref[...]
    # Numerically stable log_softmax over classes (f32 epilogue; exp/log -> EUP).
    m = jnp.max(logits, axis=-1, keepdims=True)
    shifted = logits - m
    lse = jnp.log(jnp.sum(jnp.exp(shifted), axis=-1, keepdims=True))
    # Store only the real classes. o_ref is (tb, n_cls); since the block spans the
    # full class dim, its HBM region is one contiguous chunk per grid step -> no
    # padded-lane writeback and no wrapper-side re-read of padded lanes.
    o_ref[...] = (shifted - lse)[:, : o_ref.shape[-1]]


def _round_up(a, m):
    return ((a + m - 1) // m) * m


def label_predictor(x, w1, b1, w2, b2, *, block_batch=1024):
    """x: (B, 256) f32; w1: (256, 256); b1: (1, 256); w2: (256, n_cls); b2: (1, n_cls).

    block_batch=1024 is the large-B default (amortizes the ~0.35us per-step pipeline
    overhead while keeping double-buffered f32 x tiles + scratch well under VMEM).
    """
    B, d_in = x.shape
    d_hid = w1.shape[1]
    n_cls = w2.shape[1]

    # --- weight prep at the pallas_call boundary (tiny, one-time) -----------------
    # Pad class dim to 128 lanes: zero weight columns, very negative bias so padded
    # logits vanish under exp() and never win the max(). b2p must NOT be cast to a
    # narrower dtype in a way that rounds toward -inf (exp(inf - inf) -> NaN).
    w2p = jnp.zeros((d_hid, NCLS_PAD), jnp.float32).at[:, :n_cls].set(w2)
    b2p = jnp.full((1, NCLS_PAD), -1e30, jnp.float32).at[:, :n_cls].set(b2)
    w1_bf = w1.astype(jnp.bfloat16)
    w2_bf = w2p.astype(jnp.bfloat16)
    b1_f32 = b1.astype(jnp.float32)

    # --- balanced batch tiling -----------------------------------------------------
    # >= 2 grid steps whenever there's enough work (so v7x's two TensorCores both get
    # a share via the "parallel" axis), balanced tile sizes to minimize batch padding,
    # 16-row granularity (keeps the bf16 activation slabs on native (16,128) tiling).
    min_steps = 2 if B >= 32 else 1
    n_steps = max(min_steps, pl.cdiv(B, block_batch))
    tb = _round_up(pl.cdiv(B, n_steps), 16)
    bp = n_steps * tb
    # Skip the zero-pad copy entirely when no padding is needed (x stays f32; the
    # bf16 cast happens inside the kernel).
    xp = x if bp == B else jnp.zeros((bp, d_in), x.dtype).at[:B].set(x)

    cost = pl.CostEstimate(
        flops=2 * bp * d_in * d_hid + 2 * bp * d_hid * NCLS_PAD,
        transcendentals=bp * (NCLS_PAD + 1),          # exp over padded lanes + log
        bytes_accessed=(xp.size * 4                    # f32 x read
                        + w1_bf.size * 2 + w2_bf.size * 2
                        + b1_f32.size * 4 + b2p.size * 4
                        + bp * n_cls * 4),             # dense f32 output write
    )

    out = pl.pallas_call(
        label_predictor_kernel,
        out_shape=jax.ShapeDtypeStruct((bp, n_cls), jnp.float32),
        grid=(n_steps,),
        in_specs=[
            pl.BlockSpec((tb, d_in), lambda i: (i, 0)),         # x tile (f32, double-buffered)
            pl.BlockSpec((d_in, d_hid), lambda i: (0, 0)),      # W1 (bf16) resident
            pl.BlockSpec((1, d_hid), lambda i: (0, 0)),         # b1 (f32) resident
            pl.BlockSpec((d_hid, NCLS_PAD), lambda i: (0, 0)),  # W2 padded (bf16) resident
            pl.BlockSpec((1, NCLS_PAD), lambda i: (0, 0)),      # b2 padded (f32, -1e30) resident
        ],
        out_specs=pl.BlockSpec((tb, n_cls), lambda i: (i, 0)),  # dense class dim
        compiler_params=pltpu.CompilerParams(
            dimension_semantics=("parallel",),        # batch rows independent -> megacore
            vmem_limit_bytes=32 * 1024 * 1024,        # v5e default scoped VMEM is only 16 MiB
        ),
        cost_estimate=cost,
    )(xp, w1_bf, b1_f32, w2_bf, b2p)

    # Drop batch padding only (class dim is already dense).
    return out[:B] if bp != B else out


def _reference(x, w1, b1, w2, b2):
    # Plain-JAX reference with identical bf16-operand / f32-accumulation math.
    h = jnp.maximum(
        jnp.dot(x.astype(jnp.bfloat16), w1.astype(jnp.bfloat16),
                preferred_element_type=jnp.float32) + b1, 0.0)
    logits = jnp.dot(h.astype(jnp.bfloat16), w2.astype(jnp.bfloat16),
                     preferred_element_type=jnp.float32) + b2
    return jax.nn.log_softmax(logits, axis=1)


if __name__ == "__main__":
    key = jax.random.PRNGKey(0)
    k_x, k_w1, k_b1, k_w2, k_b2, k_x2 = jax.random.split(key, 6)

    B, D_IN, D_HID, N_CLS = 8, 256, 256, 4

    # Deterministic parameter init (PyTorch Linear-style uniform bounds).
    bound1 = 1.0 / (D_IN ** 0.5)
    w1 = jax.random.uniform(k_w1, (D_IN, D_HID), jnp.float32, -bound1, bound1)
    b1 = jax.random.uniform(k_b1, (1, D_HID), jnp.float32, -bound1, bound1)
    bound2 = 1.0 / (D_HID ** 0.5)
    w2 = jax.random.uniform(k_w2, (D_HID, N_CLS), jnp.float32, -bound2, bound2)
    b2 = jax.random.uniform(k_b2, (1, N_CLS), jnp.float32, -bound2, bound2)

    # Small-batch case (single grid step, padded to 16 rows).
    x = jax.random.normal(k_x, (B, D_IN), dtype=jnp.float32)
    out = label_predictor(x, w1, b1, w2, b2)
    jax.block_until_ready(out)
    ref = _reference(x, w1, b1, w2, b2)
    assert out.shape == (B, N_CLS)
    assert jnp.allclose(out, ref, atol=1e-3, rtol=1e-3), "mismatch vs reference (B=8)"

    # Larger, non-multiple batch exercises the balanced multi-step grid (2 x 304 rows,
    # 8 padded rows) and the dense-output path.
    B2 = 600
    x2 = jax.random.normal(k_x2, (B2, D_IN), dtype=jnp.float32)
    out2 = label_predictor(x2, w1, b1, w2, b2)
    jax.block_until_ready(out2)
    ref2 = _reference(x2, w1, b1, w2, b2)
    assert out2.shape == (B2, N_CLS)
    assert jnp.allclose(out2, ref2, atol=1e-3, rtol=1e-3), "mismatch vs reference (B=600)"

    print("KERNEL_OK")
</pallas_src>

<mosaic_0001>
module attributes {stable_mosaic.version = 11 : i64} {
  func.func @label_predictor_kernel(%arg0: i32, %arg1: memref<16x256xf32, #tpu.memory_space<vmem>>, %arg2: memref<256x256xbf16, #tpu.memory_space<vmem>>, %arg3: memref<1x256xf32, #tpu.memory_space<vmem>>, %arg4: memref<256x128xbf16, #tpu.memory_space<vmem>>, %arg5: memref<1x128xf32, #tpu.memory_space<vmem>>, %arg6: memref<16x4xf32, #tpu.memory_space<vmem>>) attributes {dimension_semantics = [#tpu.dimension_semantics<parallel>], iteration_bounds = array<i64: 1>, scalar_prefetch = 0 : i64, scratch_operands = 0 : i64, tpu.core_type = #tpu.core_type<tc>, window_params = [{transform_indices = @transform_0, window_bounds = array<i64: 16, 256>}, {pipeline_mode = #tpu.pipeline_mode<synchronous>, transform_indices = @transform_1, window_bounds = array<i64: 256, 256>}, {pipeline_mode = #tpu.pipeline_mode<synchronous>, transform_indices = @transform_2, window_bounds = array<i64: 1, 256>}, {pipeline_mode = #tpu.pipeline_mode<synchronous>, transform_indices = @transform_3, window_bounds = array<i64: 256, 128>}, {pipeline_mode = #tpu.pipeline_mode<synchronous>, transform_indices = @transform_4, window_bounds = array<i64: 1, 128>}, {transform_indices = @transform_5, window_bounds = array<i64: 16, 4>}]} {
    %c0 = arith.constant 0 : index
    %c0_0 = arith.constant 0 : index
    %0 = vector.load %arg1[%c0, %c0_0] : memref<16x256xf32, #tpu.memory_space<vmem>>, vector<16x256xf32>
    %1 = arith.truncf %0 : vector<16x256xf32> to vector<16x256xbf16>
    %c0_1 = arith.constant 0 : index
    %c0_2 = arith.constant 0 : index
    %2 = vector.load %arg2[%c0_1, %c0_2] : memref<256x256xbf16, #tpu.memory_space<vmem>>, vector<256x256xbf16>
    %cst = arith.constant dense<0.000000e+00> : vector<16x256xf32>
    %3 = tpu.matmul %1, %2, %cst {dimension_numbers = #tpu.dot_dimension_numbers<[1], [0], [0], [1], [0, 0, 1, 1], [], []>} : vector<16x256xbf16>, vector<256x256xbf16>, vector<16x256xf32> -> vector<16x256xf32>
    %c0_3 = arith.constant 0 : index
    %c0_4 = arith.constant 0 : index
    %4 = vector.load %arg3[%c0_3, %c0_4] : memref<1x256xf32, #tpu.memory_space<vmem>>, vector<1x256xf32>
    %5 = vector.broadcast %4 : vector<1x256xf32> to vector<16x256xf32>
    %6 = arith.addf %3, %5 : vector<16x256xf32>
    %cst_5 = arith.constant 0.000000e+00 : f32
    %7 = vector.broadcast %cst_5 : f32 to vector<16x256xf32>
    %8 = arith.maximumf %6, %7 : vector<16x256xf32>
    %9 = arith.truncf %8 : vector<16x256xf32> to vector<16x256xbf16>
    %c0_6 = arith.constant 0 : index
    %c0_7 = arith.constant 0 : index
    %10 = vector.load %arg4[%c0_6, %c0_7] : memref<256x128xbf16, #tpu.memory_space<vmem>>, vector<256x128xbf16>
    %cst_8 = arith.constant dense<0.000000e+00> : vector<16x128xf32>
    %11 = tpu.matmul %9, %10, %cst_8 {dimension_numbers = #tpu.dot_dimension_numbers<[1], [0], [0], [1], [0, 0, 1, 1], [], []>} : vector<16x256xbf16>, vector<256x128xbf16>, vector<16x128xf32> -> vector<16x128xf32>
    %c0_9 = arith.constant 0 : index
    %c0_10 = arith.constant 0 : index
    %12 = vector.load %arg5[%c0_9, %c0_10] : memref<1x128xf32, #tpu.memory_space<vmem>>, vector<1x128xf32>
    %13 = vector.broadcast %12 : vector<1x128xf32> to vector<16x128xf32>
    %14 = arith.addf %11, %13 : vector<16x128xf32>
    %cst_11 = arith.constant dense<0xFF800000> : vector<16xf32>
    %15 = vector.multi_reduction <maximumf>, %14, %cst_11 [1] : vector<16x128xf32> to vector<16xf32>
    %16 = vector.shape_cast %15 : vector<16xf32> to vector<16x1xf32>
    %17 = vector.broadcast %16 : vector<16x1xf32> to vector<16x128xf32>
    %18 = arith.subf %14, %17 : vector<16x128xf32>
    %19 = math.exp %18 : vector<16x128xf32>
    %cst_12 = arith.constant dense<0.000000e+00> : vector<16xf32>
    %20 = vector.multi_reduction <add>, %19, %cst_12 [1] : vector<16x128xf32> to vector<16xf32>
    %21 = vector.shape_cast %20 : vector<16xf32> to vector<16x1xf32>
    %22 = math.log %21 : vector<16x1xf32>
    %23 = vector.broadcast %22 : vector<16x1xf32> to vector<16x128xf32>
    %24 = arith.subf %18, %23 : vector<16x128xf32>
    %25 = vector.extract_strided_slice %24 {offsets = [0, 0], sizes = [16, 4], strides = [1, 1]} : vector<16x128xf32> to vector<16x4xf32>
    %c0_13 = arith.constant 0 : index
    %c0_14 = arith.constant 0 : index
    %26 = vector.load %arg6[%c0_13, %c0_14] : memref<16x4xf32, #tpu.memory_space<vmem>>, vector<16x4xf32>
    tpu.vector_store %arg6[%c0_13, %c0_14], %25 {strides = array<i32>} : memref<16x4xf32, #tpu.memory_space<vmem>>, vector<16x4xf32>,
    return
  }
  func.func @transform_0(%arg0: i32) -> (i32, i32) {
    %c0_i32 = arith.constant 0 : i32
    %c0_i32_0 = arith.constant 0 : i32
    return %arg0, %c0_i32 : i32, i32
  }
  func.func @transform_1(%arg0: i32) -> (i32, i32) {
    %c0_i32 = arith.constant 0 : i32
    %c0_i32_0 = arith.constant 0 : i32
    %c0_i32_1 = arith.constant 0 : i32
    return %c0_i32, %c0_i32_0 : i32, i32
  }
  func.func @transform_2(%arg0: i32) -> (i32, i32) {
    %c0_i32 = arith.constant 0 : i32
    %c0_i32_0 = arith.constant 0 : i32
    %c0_i32_1 = arith.constant 0 : i32
    return %c0_i32, %c0_i32_0 : i32, i32
  }
  func.func @transform_3(%arg0: i32) -> (i32, i32) {
    %c0_i32 = arith.constant 0 : i32
    %c0_i32_0 = arith.constant 0 : i32
    %c0_i32_1 = arith.constant 0 : i32
    return %c0_i32, %c0_i32_0 : i32, i32
  }
  func.func @transform_4(%arg0: i32) -> (i32, i32) {
    %c0_i32 = arith.constant 0 : i32
    %c0_i32_0 = arith.constant 0 : i32
    %c0_i32_1 = arith.constant 0 : i32
    return %c0_i32, %c0_i32_0 : i32, i32
  }
  func.func @transform_5(%arg0: i32) -> (i32, i32) {
    %c0_i32 = arith.constant 0 : i32
    %c0_i32_0 = arith.constant 0 : i32
    return %arg0, %c0_i32 : i32, i32
  }
}

</mosaic_0001>

<bundles_post_ra>
// kernel: tpu_custom_call.1
= control target key start
LH: loop header
LB: loop body
LE: loop exit
PB: predicated region body
PF: predicated region fallthrough
CT: control target
= control target key end

     0   :  { %10 = vsyncpa [#allocation3], 0  ;;  %s802_s0 = inlined_call_operand.hbm [shape: f32[16,256], index: 0, kind: input, shape index: {}]   ;;  %s803_s1 = inlined_call_operand.hbm [shape: bf16[256,256], index: 1, kind: input, shape index: {}]   ;;  %s804_s2 = inlined_call_operand.vmem [shape: f32[1,256], index: 2, kind: input, shape index: {}]   ;;  %s805_s3 = inlined_call_operand.hbm [shape: bf16[256,128], index: 3, kind: input, shape index: {}]   ;;  %s806_s4 = inlined_call_operand.vmem [shape: f32[1,128], index: 4, kind: input, shape index: {}]   ;;  %s807_s5 = inlined_call_operand.vmem [shape: f32[16,4], index: 5, kind: output, shape index: {}]  }
   0x1   :  { %11 = vsyncpa [#allocation5], 0  ;;  %s742_s18 = smov [#allocation4]  }
   0x2   :  { %s29_s19 = sshll.u32 %s742_s18, 4  ;;  %s30_s19 = int_to_ptr.vmem [resolvable:$true] %s29_s19 }
   0x3   :  { %s686_s20 = scalar_lea.vmem %s30_s19, 4096  ;;  %p691_p1 = scmp.lt.s32.totalorder %s30_s19, %s30_s19 }
   0x4   :  { %p687_p0 = scmp.ne.s32.totalorder %s30_s19, %s686_s20  ;;  %p692_p2 = scmp.lt.s32.totalorder %s686_s20, %s686_s20 }
   0x6   :  { %p693_p3 = por %p692_p2, %p691_p1 }
   0x8   :  { %p694_p4 = pnand %p693_p3, %p687_p0 }
   0xa   :  { %697 = shalt.err (!%p694_p4)
}
   0xb   :  { %s743_s21 = smov 128   ;;  %s744_s22 = smov 8  }
   0xc   :  { %35 = dma.hbm_to_vmem [thread:$0]  %s803_s1, 4096, %s30_s19, [#allocation5], %s743_s21, %s743_s21, %s744_s22  }
   0xd   :  { %s745_s25 = smov [#allocation2]  }
   0xe   :  { %s17_s26 = sshll.u32 %s745_s25, 4  ;;  %s18_s26 = int_to_ptr.vmem [resolvable:$true] %s17_s26 }
   0xf   :  { %s706_s27 = scalar_lea.vmem %s18_s26, 512  ;;  %p711_p6 = scmp.lt.s32.totalorder %s18_s26, %s18_s26 }
  0x10   :  { %p707_p5 = scmp.ne.s32.totalorder %s18_s26, %s706_s27  ;;  %p712_p7 = scmp.lt.s32.totalorder %s706_s27, %s706_s27 }
  0x12   :  { %p713_p8 = por %p712_p7, %p711_p6 }
  0x14   :  { %p714_p9 = pnand %p713_p8, %p707_p5 }
  0x16   :  { %717 = shalt.err (!%p714_p9)
}
  0x17   :  { %s746_s28 = smov 256   ;;  %s747_s29 = smov 16  }
  0x18   :  { %23 = dma.hbm_to_vmem [thread:$0]  %s802_s0, 512, %s18_s26, [#allocation3], %s746_s28, %s746_s28, %s747_s29  }
  0x19   :  { %s748_s7 = smov [#allocation6]  }
  0x1a   :  { %s43_s8 = sshll.u32 %s748_s7, 4  ;;  %s44_s8 = int_to_ptr.vmem [resolvable:$true] %s43_s8 }
  0x1b   :  { %s726_s1 = scalar_lea.vmem %s44_s8, 2048  ;;  %p731_p11 = scmp.lt.s32.totalorder %s44_s8, %s44_s8 }
  0x1c   :  { %p727_p10 = scmp.ne.s32.totalorder %s44_s8, %s726_s1  ;;  %p732_p12 = scmp.lt.s32.totalorder %s726_s1, %s726_s1 }
  0x1e   :  { %p733_p13 = por %p732_p12, %p731_p11 }
  0x20   :  { %p734_p0 = pnand %p733_p13, %p727_p10 }
  0x22   :  { %737 = shalt.err (!%p734_p0)
}
  0x23   :  { %s749_s9 = smov 64   ;;  %s750_s10 = smov 4  }
  0x24   :  { %49 = dma.hbm_to_vmem [thread:$0]  %s805_s3, 2048, %s44_s8, [#allocation5], %s749_s9, %s749_s9, %s750_s10  }
  0x25   :  { %738 = dma.done.wait [#allocation3], 512  }
  0x26   :  { %739 = vsyncadd [#allocation3], 4294966784 }
  0x27   :  { %740 = dma.done.wait [#allocation5], 6144  }
  0x28   :  { %741 = vsyncadd [#allocation5], 4294961152  ;;  %v606_v0 = vld [vmem:[#allocation4 + $0x74] ss:$8 sps:$4 sm:$0xff]   ;;  %v608_v1 = vld [vmem:[#allocation4 + $0x70] ss:$8 sps:$4 sm:$0xff]   ;;  %v102_v54 = vlaneseq }
  0x29   :  { %272 = vmatprep.subr.bf16.mxu0 %v606_v0  ;;  %v609_v2 = vld [vmem:[#allocation4 + $0x64] ss:$8 sps:$4 sm:$0xff]   ;;  %v611_v3 = vld [vmem:[#allocation4 + $0x60] ss:$8 sps:$4 sm:$0xff]   ;;  %v612_v4 = vld [vmem:[#allocation4 + $0x54] ss:$8 sps:$4 sm:$0xff]  }
  0x2a   :  { %273 = vmatpush1.bf16.msra.mxu0 %v608_v1  ;;  %v614_v5 = vld [vmem:[#allocation4 + $0x50] ss:$8 sps:$4 sm:$0xff]   ;;  %v615_v6 = vld [vmem:[#allocation4 + $0x44] ss:$8 sps:$4 sm:$0xff]   ;;  %v617_v7 = vld [vmem:[#allocation4 + $0x40] ss:$8 sps:$4 sm:$0xff]  }
  0x2b   :  { %274 = vmatprep.subr.bf16.mxu0 %v609_v2  ;;  %v618_v8 = vld [vmem:[#allocation4 + $0x34] ss:$8 sps:$4 sm:$0xff]   ;;  %v620_v9 = vld [vmem:[#allocation4 + $0x30] ss:$8 sps:$4 sm:$0xff]   ;;  %v621_v10 = vld [vmem:[#allocation4 + $0x24] ss:$8 sps:$4 sm:$0xff]  }
  0x2c   :  { %v623_v11 = vld [vmem:[#allocation4 + $0x20] ss:$8 sps:$4 sm:$0xff]   ;;  %v624_v12 = vld [vmem:[#allocation4 + $0x14] ss:$8 sps:$4 sm:$0xff]   ;;  %v626_v15 = vld [vmem:[#allocation4 + $0x10] ss:$8 sps:$4 sm:$0xff]  }
  0x2d   :  { %v63_v13 = vld [vmem:[#allocation2 + $0x8] sm:$0xff]  ;;  %v65_v14 = vld [vmem:[#allocation2 + $0x18] sm:$0xff]  ;;  %v656_v21 = vld [vmem:[#allocation6 + $0x70] sm:$0xff]   ;;  %v103_v55 = vshrl.u32 %v102_v54, 7  ;;  %vm517_vm0 = vcmask 31744  }
  0x2e   :  { %275 = vmatpush1.bf16.msra.mxu0 %v611_v3  ;;  %v627_v16 = vld [vmem:[#allocation4 + $0x4] ss:$8 sps:$4 sm:$0xff]   ;;  %v67_v17 = vpack.c.bf16 %v65_v14, %v63_v13  ;;  %v654_v18 = vld [vmem:[#allocation6 + $0x78] sm:$0xff]   ;;  %v629_v20 = vld [vmem:[#allocation4] ss:$8 sps:$4 sm:$0xff]  }
  0x2f   :  { %276 = vmatprep.subr.bf16.mxu0 %v612_v4  ;;  %v655_v19 = vld [vmem:[#allocation6 + $0x38] sm:$0xff]   ;;  %575 = vmatprep.subr.bf16.mxu1 %v654_v18  ;;  %v657_v22 = vld [vmem:[#allocation6 + $0x30] sm:$0xff]   ;;  %v658_v23 = vld [vmem:[#allocation6 + $0x68] sm:$0xff]   ;;  %v108_v56 = vsub.s32 1, %v103_v55  ;;  %v104_v57 = vsub.s32 0, %v103_v55 }
  0x30   :  { %304 = vmatprep.mubr.bf16.mxu0 %v67_v17  ;;  %576 = vmatpush3.bf16.msra.mxu1 %v655_v19  ;;  %v630_v24 = vld [vmem:[#allocation4 + $0xf4] ss:$8 sps:$4 sm:$0xff]   ;;  %v632_v25 = vld [vmem:[#allocation4 + $0xf0] ss:$8 sps:$4 sm:$0xff]   ;;  %v659_v26 = vld [vmem:[#allocation6 + $0x28] sm:$0xff]  }
  0x31   :  { %577 = vmatprep.subr.bf16.mxu1 %v656_v21  ;;  %v660_v27 = vld [vmem:[#allocation6 + $0x60] sm:$0xff]   ;;  %v662_v31 = vld [vmem:[#allocation6 + $0x58] sm:$0xff]   ;;  %v64_v46 = vld [vmem:[#allocation2 + $0x10] sm:$0xff] }
  0x32   :  { %277 = vmatpush1.bf16.msra.mxu0 %v614_v5  ;;  %v633_v28 = vld [vmem:[#allocation4 + $0xe4] ss:$8 sps:$4 sm:$0xff]   ;;  %v635_v30 = vld [vmem:[#allocation4 + $0xe0] ss:$8 sps:$4 sm:$0xff]   ;;  %v636_v32 = vld [vmem:[#allocation4 + $0xd4] ss:$8 sps:$4 sm:$0xff]  }
  0x33   :  { %278 = vmatprep.subr.bf16.mxu0 %v615_v6  ;;  %v661_v29 = vld [vmem:[#allocation6 + $0x20] sm:$0xff]   ;;  %v663_v33 = vld [vmem:[#allocation6 + $0x18] sm:$0xff]   ;;  %v664_v48 = vld [vmem:[#allocation6 + $0x50] sm:$0xff]  }
  0x34   :  { %578 = vmatpush3.bf16.msra.mxu1 %v657_v22  ;;  %v638_v34 = vld [vmem:[#allocation4 + $0xd0] ss:$8 sps:$4 sm:$0xff]   ;;  %v639_v35 = vld [vmem:[#allocation4 + $0xc4] ss:$8 sps:$4 sm:$0xff]   ;;  %v641_v36 = vld [vmem:[#allocation4 + $0xc0] ss:$8 sps:$4 sm:$0xff]  }
  0x35   :  { %579 = vmatprep.subr.bf16.mxu1 %v658_v23  ;;  %v642_v37 = vld [vmem:[#allocation4 + $0xb4] ss:$8 sps:$4 sm:$0xff]   ;;  %v644_v38 = vld [vmem:[#allocation4 + $0xb0] ss:$8 sps:$4 sm:$0xff]   ;;  %v645_v39 = vld [vmem:[#allocation4 + $0xa4] ss:$8 sps:$4 sm:$0xff]  }
  0x36   :  { %279 = vmatpush1.bf16.msra.mxu0 %v617_v7  ;;  %v647_v40 = vld [vmem:[#allocation4 + $0xa0] ss:$8 sps:$4 sm:$0xff]   ;;  %v648_v41 = vld [vmem:[#allocation4 + $0x94] ss:$8 sps:$4 sm:$0xff]   ;;  %v650_v42 = vld [vmem:[#allocation4 + $0x90] ss:$8 sps:$4 sm:$0xff]  }
  0x37   :  { %280 = vmatprep.subr.bf16.mxu0 %v618_v8  ;;  %v651_v43 = vld [vmem:[#allocation4 + $0x84] ss:$8 sps:$4 sm:$0xff]   ;;  %v653_v44 = vld [vmem:[#allocation4 + $0x80] ss:$8 sps:$4 sm:$0xff]   ;;  %v665_v49 = vld [vmem:[#allocation6 + $0x10] sm:$0xff]  }
  0x38   :  { %580 = vmatpush3.bf16.msra.mxu1 %v659_v26  ;;  %v62_v45 = vld [vmem:[#allocation2] sm:$0xff]  ;;  %v666_v50 = vld [vmem:[#allocation6 + $0x48] sm:$0xff]  }
  0x39   :  { %581 = vmatprep.subr.bf16.mxu1 %v660_v27  ;;  %v66_v47 = vpack.c.bf16 %v64_v46, %v62_v45  ;;  %v667_v51 = vld [vmem:[#allocation6 + $0x8] sm:$0xff]   ;;  %v668_v52 = vld [vmem:[#allocation6 + $0x40] sm:$0xff]  }
  0x3a   :  { %281 = vmatpush1.bf16.msra.mxu0 %v620_v9  ;;  %v669_v53 = vld [vmem:[#allocation6] sm:$0xff]  }
  0x3b   :  { %282 = vmatprep.subr.bf16.mxu0 %v621_v10  ;;  %v100_v58 = vld [vmem:[%s804_s2] sm:$0x3] }
  0x3c   :  { %582 = vmatpush3.bf16.msra.mxu1 %v661_v29  ;;  %v109_v60 = vrot.slane %v100_v58, %v108_v56  ;;  %v105_v61 = vrot.slane %v100_v58, %v104_v57  ;;  %v558_v13 = vld [vmem:[%s806_s4] ss:$0 sm:$0xff] }
  0x3d   :  { %583 = vmatprep.subr.bf16.mxu1 %v662_v31 }
  0x3e   :  { %283 = vmatpush1.bf16.msra.mxu0 %v623_v11 }
  0x3f   :  { %284 = vmatprep.subr.bf16.mxu0 %v624_v12 }
  0x40   :  { %584 = vmatpush3.bf16.msra.mxu1 %v663_v33 }
  0x41   :  { %585 = vmatprep.subr.bf16.mxu1 %v664_v48 }
  0x42   :  { %285 = vmatpush1.bf16.msra.mxu0 %v626_v15 }
  0x43   :  { %286 = vmatprep.subr.bf16.mxu0 %v627_v16 }
  0x44   :  { %586 = vmatpush3.bf16.msra.mxu1 %v665_v49 }
  0x45   :  { %587 = vmatprep.subr.bf16.mxu1 %v666_v50 }
  0x46   :  { %287 = vmatpush1.bf16.msra.mxu0 %v629_v20 }
  0x47   :  { %288 = vmatprep.subr.bf16.mxu0 %v630_v24 }
  0x48   :  { %588 = vmatpush3.bf16.msra.mxu1 %v667_v51 }
  0x49   :  { %589 = vmatprep.subr.bf16.mxu1 %v668_v52 }
  0x4a   :  { %289 = vmatpush2.bf16.msra.mxu0 %v632_v25 }
  0x4b   :  { %290 = vmatprep.subr.bf16.mxu0 %v633_v28 }
  0x4c   :  { %590 = vmatpush3.bf16.msra.mxu1 %v669_v53 }
  0x4e   :  { %291 = vmatpush2.bf16.msra.mxu0 %v635_v30 }
  0x4f   :  { %292 = vmatprep.subr.bf16.mxu0 %v636_v32 }
  0x52   :  { %293 = vmatpush2.bf16.msra.mxu0 %v638_v34 }
  0x53   :  { %294 = vmatprep.subr.bf16.mxu0 %v639_v35 }
  0x56   :  { %295 = vmatpush2.bf16.msra.mxu0 %v641_v36 }
  0x57   :  { %296 = vmatprep.subr.bf16.mxu0 %v642_v37 }
  0x5a   :  { %297 = vmatpush2.bf16.msra.mxu0 %v644_v38 }
  0x5b   :  { %298 = vmatprep.subr.bf16.mxu0 %v645_v39 }
  0x5e   :  { %299 = vmatpush2.bf16.msra.mxu0 %v647_v40 }
  0x5f   :  { %300 = vmatprep.subr.bf16.mxu0 %v648_v41 }
  0x62   :  { %301 = vmatpush2.bf16.msra.mxu0 %v650_v42 }
  0x63   :  { %302 = vmatprep.subr.bf16.mxu0 %v651_v43 }
  0x66   :  { %303 = vmatpush2.bf16.msra.mxu0 %v653_v44 }
  0x69   :  { %305 = vmatmul.mubr.bf16.vlgmr.msra.gmra.mxu0 %v66_v47 }
 0x129   :  { %v306_v59 = vpop.f32.mrf.mxu0 }
 0x12a   :  { %v307_v2 = vadd.f32 %v306_v59, %v105_v61 }
 0x12b   :  { %v308_v62 = vpop.f32.mrf.mxu0 }
 0x12c   :  { %v309_v0 = vadd.f32 %v308_v62, %v109_v60  ;;  %v315_v8 = vmax.f32 %v307_v2, 0.0 }
 0x12d   :  { %v310_v63 = vpop.f32.mrf.mxu0 }
 0x12e   :  { %v311_v1 = vadd.f32 %v310_v63, %v105_v61  ;;  %v316_v6 = vmax.f32 %v309_v0, 0.0 }
 0x12f   :  { %v312_v3 = vpop.f32.mrf.mxu0 }
 0x130   :  { %v313_v4 = vadd.f32 %v312_v3, %v109_v60  ;;  %v317_v5 = vmax.f32 %v311_v1, 0.0 }
 0x132   :  { %v318_v7 = vmax.f32 %v313_v4, 0.0  ;;  %v319_v10 = vpack.c.bf16 %v317_v5, %v315_v8 }
 0x134   :  { %v320_v9 = vpack.c.bf16 %v318_v7, %v316_v6 }
 0x136   :  { %488 = vmatprep.mubr.bf16.mxu1 %v320_v9 }
 0x137   :  { %489 = vmatmul.mubr.bf16.vlgmr.msra.gmra.mxu1 %v319_v10 }
 0x1f7   :  { %v591_v11 = vpop.f32.mrf.mxu1 }
 0x1f9   :  { %v592_v12 = vpop.f32.mrf.mxu1 }
 0x1fa   :  { %v593_v14 = vadd.f32 %v592_v12, %v591_v11 }
 0x1fb   :  { %v594_v15 = vpop.f32.mrf.mxu1 }
 0x1fc   :  { %v491_v16 = vadd.f32 %v593_v14, %v558_v13 }
 0x1fd   :  { %v595_v17 = vpop.f32.mrf.mxu1 }
 0x1fe   :  { %v596_v18 = vadd.f32 %v595_v17, %v594_v15  ;;  %497 = vmax.xlane.f32.xlu0 %v491_v16 }
 0x200   :  { %v494_v19 = vadd.f32 %v596_v18, %v558_v13 }
 0x202   :  { %499 = vmax.xlane.f32.xlu0 %v494_v19 }
 0x287   :  { %v498_v20 = vpop.xlane.xlu0 %497 }
 0x288   :  { %v501_v21 = vsub.f32 %v491_v16, %v498_v20 }
 0x28a   :  { %v503_v22 = vmul.f32 1.442695, %v501_v21 }
 0x28b   :  { %v500_v23 = vpop.xlane.xlu0 %499 }
 0x28c   :  { %v502_v24 = vsub.f32 %v494_v19, %v500_v23  ;;  %670 = vpow2.f32 %v503_v22 }
 0x28e   :  { %v505_v25 = vmul.f32 1.442695, %v502_v24 }
 0x290   :  { %672 = vpow2.f32 %v505_v25 }
 0x299   :  { %v671_v26 = vpop.eup %670 }
 0x29a   :  { %507 = vadd.xlane.f32.xlu1 %v671_v26 }
 0x29d   :  { %v673_v27 = vpop.eup %672 }
 0x29e   :  { %509 = vadd.xlane.f32.xlu1 %v673_v27 }
 0x323   :  { %v508_v28 = vpop.xlane.xlu1 %507 }
 0x324   :  { %674 = vlog2.f32 %v508_v28 }
 0x327   :  { %v510_v29 = vpop.xlane.xlu1 %509 }
 0x328   :  { %676 = vlog2.f32 %v510_v29 }
 0x331   :  { %v675_v30 = vpop.eup %674 }
 0x332   :  { %v512_v31 = vmul.f32 0.6931472, %v675_v30 }
 0x334   :  { %v515_v32 = vsub.f32 %v501_v21, %v512_v31 }
 0x335   :  { %v677_v33 = vpop.eup %676 }
 0x336   :  { %518 = vst.msk [vmem:[%s807_s5] sm:$0xff] %vm517_vm0, %v515_v32  ;;  %v514_v34 = vmul.f32 0.6931472, %v677_v33 }
 0x338   :  { %v516_v35 = vsub.f32 %v502_v24, %v514_v34 }
 0x33a   :  { %519 = vst.msk [vmem:[%s807_s5 + $0x8] sm:$0xff] %vm517_vm0, %v516_v35 }
 0x33b   :  { %524 = vsyncpa [#allocation3], 1 }
 0x33c   :  { %525 = vsyncpa [#allocation5], 1 }

</bundles_post_ra>
